<compile_context>
chip_gen: v6e
topology: v6e:2x2x1
jax: 0.10.0
libtpu: 0.0.40
codegen_flags: <defaults>
</compile_context>

<pallas_src>
import jax
import jax.numpy as jnp
from jax.experimental import pallas as pl
from jax.experimental.pallas import tpu as pltpu


HIDDEN = 256
EMB = 50
EMB_PAD = 128            # layer-2 output padded to a full lane width (zero columns)
NEG_SLOPE = 0.2
COS_EPS = 1e-8
TB_MAX = 1024            # max batch-tile rows


def _leaky_relu(x):
    return jnp.where(x > 0, x, NEG_SLOPE * x)


def rank_model_kernel(
    gene1_ref, gene2_ref, disease_ref,
    w1_ref, b1_ref, w2_ref, b2_ref,          # self.model params (bf16 W, f32 b)
    w1d_ref, b1d_ref, w2d_ref, b2d_ref,      # self.model2 params
    out_ref,
):
    tb = gene1_ref.shape[0]

    # ---- fused gene MLP (gene1 & gene2 share self.model) -> one wide matmul per layer
    genes = jnp.concatenate([gene1_ref[...], gene2_ref[...]], axis=0)   # [2TB, F] f32
    h = jnp.dot(genes.astype(jnp.bfloat16), w1_ref[...],
                preferred_element_type=jnp.float32) + b1_ref[...]
    h = _leaky_relu(h)                                                  # f32 [2TB, 256]
    o = jnp.dot(h.astype(jnp.bfloat16), w2_ref[...],
                preferred_element_type=jnp.float32) + b2_ref[...]
    o = _leaky_relu(o)                                                  # f32 [2TB, 128]
    g1 = o[:tb]
    g2 = o[tb:]

    # ---- disease MLP (self.model2)
    hd = jnp.dot(disease_ref[...].astype(jnp.bfloat16), w1d_ref[...],
                 preferred_element_type=jnp.float32) + b1d_ref[...]
    hd = _leaky_relu(hd)
    d1 = jnp.dot(hd.astype(jnp.bfloat16), w2d_ref[...],
                 preferred_element_type=jnp.float32) + b2d_ref[...]
    d1 = _leaky_relu(d1)                                                # f32 [TB, 128]

    # ---- cosine similarities: hoist the d1 norm, single rsqrt per similarity.
    # 1 / max(sqrt(x), eps) == min(rsqrt(x), 1/eps)   (exact, incl. x == 0)
    nd2 = jnp.sum(d1 * d1, axis=-1, keepdims=True)
    n1_2 = jnp.sum(g1 * g1, axis=-1, keepdims=True)
    n2_2 = jnp.sum(g2 * g2, axis=-1, keepdims=True)
    dot1 = jnp.sum(g1 * d1, axis=-1, keepdims=True)
    dot2 = jnp.sum(g2 * d1, axis=-1, keepdims=True)
    inv_cap = jnp.float32(1.0 / COS_EPS)
    s1 = dot1 * jnp.minimum(jax.lax.rsqrt(n1_2 * nd2), inv_cap)
    s2 = dot2 * jnp.minimum(jax.lax.rsqrt(n2_2 * nd2), inv_cap)

    out_ref[...] = jax.nn.sigmoid(s1 - s2)                              # [TB, 1]


def _pick_batch_tile(batch, feat):
    """Largest multiple-of-8 tile keeping double-buffered f32 input tiles ~<= 12 MiB,
    then rebalanced so the padded batch wastes as little as possible."""
    b8 = pl.cdiv(batch, 8) * 8
    rows = (12 * 2**20) // max(2 * 3 * feat * 4, 1)   # 2 buffers x 3 inputs x F x 4B
    tb = max(8, min(TB_MAX, (rows // 8) * 8))
    tb = min(tb, b8)
    # Rebalance: same number of grid steps, smallest tile -> minimal padding.
    n_tiles = pl.cdiv(b8, tb)
    tb = pl.cdiv(pl.cdiv(b8, n_tiles), 8) * 8
    return tb


@jax.jit
def rank_model_forward(gene1, gene2, disease, params):
    """params: dict with w1,b1,w2,b2 (self.model) and w1d,b1d,w2d,b2d (self.model2).
    Weights stored transposed as [in, out]; biases as [1, out]."""
    B, F = gene1.shape
    TB = _pick_batch_tile(B, F)
    B_pad = pl.cdiv(B, TB) * TB
    pad = B_pad - B
    if pad:
        gene1 = jnp.pad(gene1, ((0, pad), (0, 0)))
        gene2 = jnp.pad(gene2, ((0, pad), (0, 0)))
        disease = jnp.pad(disease, ((0, pad), (0, 0)))

    # bf16 matmul operands (MXU density / half the weight DMA); biases stay f32.
    def layer2_pad(w, b):
        """Zero-pad the 50-wide output layer to 128 lanes (mathematically inert)."""
        extra = EMB_PAD - w.shape[1]
        if extra:
            w = jnp.pad(w, ((0, 0), (0, extra)))
            b = jnp.pad(b, ((0, 0), (0, extra)))
        return w, b

    w1 = params["w1"].astype(jnp.bfloat16)
    w1d = params["w1d"].astype(jnp.bfloat16)
    b1 = params["b1"].astype(jnp.float32)
    b1d = params["b1d"].astype(jnp.float32)
    w2, b2 = layer2_pad(params["w2"].astype(jnp.bfloat16),
                        params["b2"].astype(jnp.float32))
    w2d, b2d = layer2_pad(params["w2d"].astype(jnp.bfloat16),
                          params["b2d"].astype(jnp.float32))

    data_spec = pl.BlockSpec((TB, F), lambda i: (i, 0))

    def resident_spec(arr):
        return pl.BlockSpec(arr.shape, lambda i: (0, 0))

    weights = (w1, b1, w2, b2, w1d, b1d, w2d, b2d)

    flops = 2 * 3 * B_pad * (F * HIDDEN + HIDDEN * EMB_PAD)
    weight_bytes = sum(int(w.size) * w.dtype.itemsize for w in weights)
    bytes_accessed = 3 * B_pad * F * 4 + B_pad * 4 + weight_bytes

    out = pl.pallas_call(
        rank_model_kernel,
        out_shape=jax.ShapeDtypeStruct((B_pad, 1), jnp.float32),
        grid=(B_pad // TB,),
        in_specs=[data_spec, data_spec, data_spec]
                 + [resident_spec(w) for w in weights],
        out_specs=pl.BlockSpec((TB, 1), lambda i: (i, 0)),
        compiler_params=pltpu.CompilerParams(
            dimension_semantics=("parallel",),       # batch tiles split across TCs (v7x)
            vmem_limit_bytes=48 * 1024 * 1024,
        ),
        cost_estimate=pl.CostEstimate(
            flops=flops,
            transcendentals=5 * B_pad,               # 2x rsqrt + sigmoid per row
            bytes_accessed=bytes_accessed,
        ),
    )(gene1, gene2, disease, *weights)
    return out[:B, 0]  # match PyTorch: shape (B,)


def init_params(key, num_feature):
    """Deterministic init mirroring nn.Linear default (uniform +-1/sqrt(fan_in))."""
    ks = jax.random.split(key, 8)

    def linear(kw, kb, fan_in, fan_out):
        bound = 1.0 / jnp.sqrt(jnp.float32(fan_in))
        # stored transposed: [in, out]
        w = jax.random.uniform(kw, (fan_in, fan_out), jnp.float32, -bound, bound)
        b = jax.random.uniform(kb, (1, fan_out), jnp.float32, -bound, bound)
        return w, b

    w1, b1 = linear(ks[0], ks[1], num_feature, HIDDEN)
    w2, b2 = linear(ks[2], ks[3], HIDDEN, EMB)
    w1d, b1d = linear(ks[4], ks[5], num_feature, HIDDEN)
    w2d, b2d = linear(ks[6], ks[7], HIDDEN, EMB)
    return dict(w1=w1, b1=b1, w2=w2, b2=b2, w1d=w1d, b1d=b1d, w2d=w2d, b2d=b2d)


def reference_forward(gene1, gene2, disease, p):
    """Plain-JAX reference (same bf16-operand / f32-accumulate matmul recipe)."""
    def mlp(x, w1, b1, w2, b2):
        h = _leaky_relu(
            jnp.dot(x.astype(jnp.bfloat16), w1.astype(jnp.bfloat16),
                    preferred_element_type=jnp.float32) + b1)
        return _leaky_relu(
            jnp.dot(h.astype(jnp.bfloat16), w2.astype(jnp.bfloat16),
                    preferred_element_type=jnp.float32) + b2)

    g1 = mlp(gene1, p["w1"], p["b1"], p["w2"], p["b2"])
    g2 = mlp(gene2, p["w1"], p["b1"], p["w2"], p["b2"])
    d1 = mlp(disease, p["w1d"], p["b1d"], p["w2d"], p["b2d"])

    def cos(a, b):
        num = jnp.sum(a * b, -1)
        den = jnp.maximum(jnp.linalg.norm(a, axis=-1) * jnp.linalg.norm(b, axis=-1),
                          COS_EPS)
        return num / den

    return jax.nn.sigmoid(cos(g1, d1) - cos(g2, d1))


if __name__ == "__main__":
    B = 8            # batch
    NUM_FEATURE = 32 # input feature dim

    key = jax.random.PRNGKey(0)
    kp, kg1, kg2, kd = jax.random.split(key, 4)

    params = init_params(kp, NUM_FEATURE)
    gene1 = jax.random.normal(kg1, (B, NUM_FEATURE), jnp.float32)
    gene2 = jax.random.normal(kg2, (B, NUM_FEATURE), jnp.float32)
    disease = jax.random.normal(kd, (B, NUM_FEATURE), jnp.float32)

    out = rank_model_forward(gene1, gene2, disease, params)
    out = jax.block_until_ready(out)

    ref = reference_forward(gene1, gene2, disease, params)
    assert out.shape == (B,)
    assert jnp.allclose(out, ref, atol=2e-3, rtol=2e-3), (out, ref)

    print("KERNEL_OK")
</pallas_src>

<mosaic_0001>
module attributes {stable_mosaic.version = 11 : i64} {
  func.func @rank_model_kernel(%arg0: i32, %arg1: memref<8x32xf32, #tpu.memory_space<vmem>>, %arg2: memref<8x32xf32, #tpu.memory_space<vmem>>, %arg3: memref<8x32xf32, #tpu.memory_space<vmem>>, %arg4: memref<32x256xbf16, #tpu.memory_space<vmem>>, %arg5: memref<1x256xf32, #tpu.memory_space<vmem>>, %arg6: memref<256x128xbf16, #tpu.memory_space<vmem>>, %arg7: memref<1x128xf32, #tpu.memory_space<vmem>>, %arg8: memref<32x256xbf16, #tpu.memory_space<vmem>>, %arg9: memref<1x256xf32, #tpu.memory_space<vmem>>, %arg10: memref<256x128xbf16, #tpu.memory_space<vmem>>, %arg11: memref<1x128xf32, #tpu.memory_space<vmem>>, %arg12: memref<8x1xf32, #tpu.memory_space<vmem>>) attributes {dimension_semantics = [#tpu.dimension_semantics<parallel>], iteration_bounds = array<i64: 1>, scalar_prefetch = 0 : i64, scratch_operands = 0 : i64, tpu.core_type = #tpu.core_type<tc>, window_params = [{transform_indices = @transform_0, window_bounds = array<i64: 8, 32>}, {transform_indices = @transform_1, window_bounds = array<i64: 8, 32>}, {transform_indices = @transform_2, window_bounds = array<i64: 8, 32>}, {pipeline_mode = #tpu.pipeline_mode<synchronous>, transform_indices = @transform_3, window_bounds = array<i64: 32, 256>}, {pipeline_mode = #tpu.pipeline_mode<synchronous>, transform_indices = @transform_4, window_bounds = array<i64: 1, 256>}, {pipeline_mode = #tpu.pipeline_mode<synchronous>, transform_indices = @transform_5, window_bounds = array<i64: 256, 128>}, {pipeline_mode = #tpu.pipeline_mode<synchronous>, transform_indices = @transform_6, window_bounds = array<i64: 1, 128>}, {pipeline_mode = #tpu.pipeline_mode<synchronous>, transform_indices = @transform_7, window_bounds = array<i64: 32, 256>}, {pipeline_mode = #tpu.pipeline_mode<synchronous>, transform_indices = @transform_8, window_bounds = array<i64: 1, 256>}, {pipeline_mode = #tpu.pipeline_mode<synchronous>, transform_indices = @transform_9, window_bounds = array<i64: 256, 128>}, {pipeline_mode = #tpu.pipeline_mode<synchronous>, transform_indices = @transform_10, window_bounds = array<i64: 1, 128>}, {transform_indices = @transform_11, window_bounds = array<i64: 8, 1>}]} {
    %c0 = arith.constant 0 : index
    %c0_0 = arith.constant 0 : index
    %0 = vector.load %arg1[%c0, %c0_0] : memref<8x32xf32, #tpu.memory_space<vmem>>, vector<8x32xf32>
    %c0_1 = arith.constant 0 : index
    %c0_2 = arith.constant 0 : index
    %1 = vector.load %arg2[%c0_1, %c0_2] : memref<8x32xf32, #tpu.memory_space<vmem>>, vector<8x32xf32>
    %2 = tpu.concatenate %0, %1 in 0 : vector<8x32xf32>, vector<8x32xf32> -> vector<16x32xf32>
    %3 = arith.truncf %2 : vector<16x32xf32> to vector<16x32xbf16>
    %c0_3 = arith.constant 0 : index
    %c0_4 = arith.constant 0 : index
    %4 = vector.load %arg4[%c0_3, %c0_4] : memref<32x256xbf16, #tpu.memory_space<vmem>>, vector<32x256xbf16>
    %cst = arith.constant dense<0.000000e+00> : vector<16x256xf32>
    %5 = tpu.matmul %3, %4, %cst {dimension_numbers = #tpu.dot_dimension_numbers<[1], [0], [0], [1], [0, 0, 1, 1], [], []>} : vector<16x32xbf16>, vector<32x256xbf16>, vector<16x256xf32> -> vector<16x256xf32>
    %c0_5 = arith.constant 0 : index
    %c0_6 = arith.constant 0 : index
    %6 = vector.load %arg5[%c0_5, %c0_6] : memref<1x256xf32, #tpu.memory_space<vmem>>, vector<1x256xf32>
    %7 = vector.broadcast %6 : vector<1x256xf32> to vector<16x256xf32>
    %8 = arith.addf %5, %7 : vector<16x256xf32>
    %cst_7 = arith.constant 0.000000e+00 : f32
    %9 = vector.broadcast %cst_7 : f32 to vector<16x256xf32>
    %10 = arith.cmpf ogt, %8, %9 : vector<16x256xf32>
    %cst_8 = arith.constant 2.000000e-01 : f32
    %11 = vector.broadcast %cst_8 : f32 to vector<16x256xf32>
    %12 = arith.mulf %11, %8 : vector<16x256xf32>
    %13 = arith.select %10, %8, %12 : vector<16x256xi1>, vector<16x256xf32>
    %14 = arith.truncf %13 : vector<16x256xf32> to vector<16x256xbf16>
    %c0_9 = arith.constant 0 : index
    %c0_10 = arith.constant 0 : index
    %15 = vector.load %arg6[%c0_9, %c0_10] : memref<256x128xbf16, #tpu.memory_space<vmem>>, vector<256x128xbf16>
    %cst_11 = arith.constant dense<0.000000e+00> : vector<16x128xf32>
    %16 = tpu.matmul %14, %15, %cst_11 {dimension_numbers = #tpu.dot_dimension_numbers<[1], [0], [0], [1], [0, 0, 1, 1], [], []>} : vector<16x256xbf16>, vector<256x128xbf16>, vector<16x128xf32> -> vector<16x128xf32>
    %c0_12 = arith.constant 0 : index
    %c0_13 = arith.constant 0 : index
    %17 = vector.load %arg7[%c0_12, %c0_13] : memref<1x128xf32, #tpu.memory_space<vmem>>, vector<1x128xf32>
    %18 = vector.broadcast %17 : vector<1x128xf32> to vector<16x128xf32>
    %19 = arith.addf %16, %18 : vector<16x128xf32>
    %cst_14 = arith.constant 0.000000e+00 : f32
    %20 = vector.broadcast %cst_14 : f32 to vector<16x128xf32>
    %21 = arith.cmpf ogt, %19, %20 : vector<16x128xf32>
    %cst_15 = arith.constant 2.000000e-01 : f32
    %22 = vector.broadcast %cst_15 : f32 to vector<16x128xf32>
    %23 = arith.mulf %22, %19 : vector<16x128xf32>
    %24 = arith.select %21, %19, %23 : vector<16x128xi1>, vector<16x128xf32>
    %25 = vector.extract_strided_slice %24 {offsets = [0, 0], sizes = [8, 128], strides = [1, 1]} : vector<16x128xf32> to vector<8x128xf32>
    %26 = vector.extract_strided_slice %24 {offsets = [8, 0], sizes = [8, 128], strides = [1, 1]} : vector<16x128xf32> to vector<8x128xf32>
    %c0_16 = arith.constant 0 : index
    %c0_17 = arith.constant 0 : index
    %27 = vector.load %arg3[%c0_16, %c0_17] : memref<8x32xf32, #tpu.memory_space<vmem>>, vector<8x32xf32>
    %28 = arith.truncf %27 : vector<8x32xf32> to vector<8x32xbf16>
    %c0_18 = arith.constant 0 : index
    %c0_19 = arith.constant 0 : index
    %29 = vector.load %arg8[%c0_18, %c0_19] : memref<32x256xbf16, #tpu.memory_space<vmem>>, vector<32x256xbf16>
    %cst_20 = arith.constant dense<0.000000e+00> : vector<8x256xf32>
    %30 = tpu.matmul %28, %29, %cst_20 {dimension_numbers = #tpu.dot_dimension_numbers<[1], [0], [0], [1], [0, 0, 1, 1], [], []>} : vector<8x32xbf16>, vector<32x256xbf16>, vector<8x256xf32> -> vector<8x256xf32>
    %c0_21 = arith.constant 0 : index
    %c0_22 = arith.constant 0 : index
    %31 = vector.load %arg9[%c0_21, %c0_22] : memref<1x256xf32, #tpu.memory_space<vmem>>, vector<1x256xf32>
    %32 = vector.broadcast %31 : vector<1x256xf32> to vector<8x256xf32>
    %33 = arith.addf %30, %32 : vector<8x256xf32>
    %cst_23 = arith.constant 0.000000e+00 : f32
    %34 = vector.broadcast %cst_23 : f32 to vector<8x256xf32>
    %35 = arith.cmpf ogt, %33, %34 : vector<8x256xf32>
    %cst_24 = arith.constant 2.000000e-01 : f32
    %36 = vector.broadcast %cst_24 : f32 to vector<8x256xf32>
    %37 = arith.mulf %36, %33 : vector<8x256xf32>
    %38 = arith.select %35, %33, %37 : vector<8x256xi1>, vector<8x256xf32>
    %39 = arith.truncf %38 : vector<8x256xf32> to vector<8x256xbf16>
    %c0_25 = arith.constant 0 : index
    %c0_26 = arith.constant 0 : index
    %40 = vector.load %arg10[%c0_25, %c0_26] : memref<256x128xbf16, #tpu.memory_space<vmem>>, vector<256x128xbf16>
    %cst_27 = arith.constant dense<0.000000e+00> : vector<8x128xf32>
    %41 = tpu.matmul %39, %40, %cst_27 {dimension_numbers = #tpu.dot_dimension_numbers<[1], [0], [0], [1], [0, 0, 1, 1], [], []>} : vector<8x256xbf16>, vector<256x128xbf16>, vector<8x128xf32> -> vector<8x128xf32>
    %c0_28 = arith.constant 0 : index
    %c0_29 = arith.constant 0 : index
    %42 = vector.load %arg11[%c0_28, %c0_29] : memref<1x128xf32, #tpu.memory_space<vmem>>, vector<1x128xf32>
    %43 = vector.broadcast %42 : vector<1x128xf32> to vector<8x128xf32>
    %44 = arith.addf %41, %43 : vector<8x128xf32>
    %cst_30 = arith.constant 0.000000e+00 : f32
    %45 = vector.broadcast %cst_30 : f32 to vector<8x128xf32>
    %46 = arith.cmpf ogt, %44, %45 : vector<8x128xf32>
    %cst_31 = arith.constant 2.000000e-01 : f32
    %47 = vector.broadcast %cst_31 : f32 to vector<8x128xf32>
    %48 = arith.mulf %47, %44 : vector<8x128xf32>
    %49 = arith.select %46, %44, %48 : vector<8x128xi1>, vector<8x128xf32>
    %50 = arith.mulf %49, %49 : vector<8x128xf32>
    %cst_32 = arith.constant dense<0.000000e+00> : vector<8xf32>
    %51 = vector.multi_reduction <add>, %50, %cst_32 [1] : vector<8x128xf32> to vector<8xf32>
    %52 = vector.shape_cast %51 : vector<8xf32> to vector<8x1xf32>
    %53 = arith.mulf %25, %25 : vector<8x128xf32>
    %cst_33 = arith.constant dense<0.000000e+00> : vector<8xf32>
    %54 = vector.multi_reduction <add>, %53, %cst_33 [1] : vector<8x128xf32> to vector<8xf32>
    %55 = vector.shape_cast %54 : vector<8xf32> to vector<8x1xf32>
    %56 = arith.mulf %26, %26 : vector<8x128xf32>
    %cst_34 = arith.constant dense<0.000000e+00> : vector<8xf32>
    %57 = vector.multi_reduction <add>, %56, %cst_34 [1] : vector<8x128xf32> to vector<8xf32>
    %58 = vector.shape_cast %57 : vector<8xf32> to vector<8x1xf32>
    %59 = arith.mulf %25, %49 : vector<8x128xf32>
    %cst_35 = arith.constant dense<0.000000e+00> : vector<8xf32>
    %60 = vector.multi_reduction <add>, %59, %cst_35 [1] : vector<8x128xf32> to vector<8xf32>
    %61 = vector.shape_cast %60 : vector<8xf32> to vector<8x1xf32>
    %62 = arith.mulf %26, %49 : vector<8x128xf32>
    %cst_36 = arith.constant dense<0.000000e+00> : vector<8xf32>
    %63 = vector.multi_reduction <add>, %62, %cst_36 [1] : vector<8x128xf32> to vector<8xf32>
    %64 = vector.shape_cast %63 : vector<8xf32> to vector<8x1xf32>
    %65 = arith.mulf %55, %52 : vector<8x1xf32>
    %66 = math.rsqrt %65 : vector<8x1xf32>
    %cst_37 = arith.constant 1.000000e+08 : f32
    %67 = vector.broadcast %cst_37 : f32 to vector<8x1xf32>
    %68 = arith.minimumf %66, %67 : vector<8x1xf32>
    %69 = arith.mulf %61, %68 : vector<8x1xf32>
    %70 = arith.mulf %58, %52 : vector<8x1xf32>
    %71 = math.rsqrt %70 : vector<8x1xf32>
    %cst_38 = arith.constant 1.000000e+08 : f32
    %72 = vector.broadcast %cst_38 : f32 to vector<8x1xf32>
    %73 = arith.minimumf %71, %72 : vector<8x1xf32>
    %74 = arith.mulf %64, %73 : vector<8x1xf32>
    %75 = arith.subf %69, %74 : vector<8x1xf32>
    %76 = arith.negf %75 : vector<8x1xf32>
    %77 = math.exp %76 : vector<8x1xf32>
    %cst_39 = arith.constant 1.000000e+00 : f32
    %78 = vector.broadcast %cst_39 : f32 to vector<8x1xf32>
    %79 = arith.addf %78, %77 : vector<8x1xf32>
    %80 = arith.divf %78, %79 : vector<8x1xf32>
    %c0_40 = arith.constant 0 : index
    %c0_41 = arith.constant 0 : index
    %81 = vector.load %arg12[%c0_40, %c0_41] : memref<8x1xf32, #tpu.memory_space<vmem>>, vector<8x1xf32>
    tpu.vector_store %arg12[%c0_40, %c0_41], %80 {strides = array<i32>} : memref<8x1xf32, #tpu.memory_space<vmem>>, vector<8x1xf32>,
    return
  }
  func.func @transform_0(%arg0: i32) -> (i32, i32) {
    %c0_i32 = arith.constant 0 : i32
    %c0_i32_0 = arith.constant 0 : i32
    return %arg0, %c0_i32 : i32, i32
  }
  func.func @transform_1(%arg0: i32) -> (i32, i32) {
    %c0_i32 = arith.constant 0 : i32
    %c0_i32_0 = arith.constant 0 : i32
    return %arg0, %c0_i32 : i32, i32
  }
  func.func @transform_2(%arg0: i32) -> (i32, i32) {
    %c0_i32 = arith.constant 0 : i32
    %c0_i32_0 = arith.constant 0 : i32
    return %arg0, %c0_i32 : i32, i32
  }
  func.func @transform_3(%arg0: i32) -> (i32, i32) {
    %c0_i32 = arith.constant 0 : i32
    %c0_i32_0 = arith.constant 0 : i32
    %c0_i32_1 = arith.constant 0 : i32
    return %c0_i32, %c0_i32_0 : i32, i32
  }
  func.func @transform_4(%arg0: i32) -> (i32, i32) {
    %c0_i32 = arith.constant 0 : i32
    %c0_i32_0 = arith.constant 0 : i32
    %c0_i32_1 = arith.constant 0 : i32
    return %c0_i32, %c0_i32_0 : i32, i32
  }
  func.func @transform_5(%arg0: i32) -> (i32, i32) {
    %c0_i32 = arith.constant 0 : i32
    %c0_i32_0 = arith.constant 0 : i32
    %c0_i32_1 = arith.constant 0 : i32
    return %c0_i32, %c0_i32_0 : i32, i32
  }
  func.func @transform_6(%arg0: i32) -> (i32, i32) {
    %c0_i32 = arith.constant 0 : i32
    %c0_i32_0 = arith.constant 0 : i32
    %c0_i32_1 = arith.constant 0 : i32
    return %c0_i32, %c0_i32_0 : i32, i32
  }
  func.func @transform_7(%arg0: i32) -> (i32, i32) {
    %c0_i32 = arith.constant 0 : i32
    %c0_i32_0 = arith.constant 0 : i32
    %c0_i32_1 = arith.constant 0 : i32
    return %c0_i32, %c0_i32_0 : i32, i32
  }
  func.func @transform_8(%arg0: i32) -> (i32, i32) {
    %c0_i32 = arith.constant 0 : i32
    %c0_i32_0 = arith.constant 0 : i32
    %c0_i32_1 = arith.constant 0 : i32
    return %c0_i32, %c0_i32_0 : i32, i32
  }
  func.func @transform_9(%arg0: i32) -> (i32, i32) {
    %c0_i32 = arith.constant 0 : i32
    %c0_i32_0 = arith.constant 0 : i32
    %c0_i32_1 = arith.constant 0 : i32
    return %c0_i32, %c0_i32_0 : i32, i32
  }
  func.func @transform_10(%arg0: i32) -> (i32, i32) {
    %c0_i32 = arith.constant 0 : i32
    %c0_i32_0 = arith.constant 0 : i32
    %c0_i32_1 = arith.constant 0 : i32
    return %c0_i32, %c0_i32_0 : i32, i32
  }
  func.func @transform_11(%arg0: i32) -> (i32, i32) {
    %c0_i32 = arith.constant 0 : i32
    %c0_i32_0 = arith.constant 0 : i32
    return %arg0, %c0_i32 : i32, i32
  }
}

</mosaic_0001>

<bundles_post_ra>
// kernel: rank_model_forward.1
= control target key start
LH: loop header
LB: loop body
LE: loop exit
PB: predicated region body
PF: predicated region fallthrough
CT: control target
= control target key end

     0   :  { %v767_v1 = vmov 0   ;;  %vm78_vm0 = vcmask 261120   ;;  %v48_v46 = vlaneseq  ;;  %vm619_vm10 = vcmask 7168   ;;  %s972_s3 = inlined_call_operand.vmem [shape: bf16[32,256], index: 3, kind: input, shape index: {}]   ;;  %s973_s7 = inlined_call_operand.vmem [shape: bf16[32,256], index: 7, kind: input, shape index: {}]   ;;  %s974_s0 = inlined_call_operand.vmem [shape: f32[8,32], index: 0, kind: input, shape index: {}]   ;;  %s975_s1 = inlined_call_operand.vmem [shape: f32[8,32], index: 1, kind: input, shape index: {}]   ;;  %s976_s2 = inlined_call_operand.vmem [shape: f32[8,32], index: 2, kind: input, shape index: {}]   ;;  %s977_s9 = inlined_call_operand.vmem [shape: bf16[256,128], index: 9, kind: input, shape index: {}]   ;;  %s978_s5 = inlined_call_operand.vmem [shape: bf16[256,128], index: 5, kind: input, shape index: {}]   ;;  %s979_s8 = inlined_call_operand.vmem [shape: f32[1,256], index: 8, kind: input, shape index: {}]   ;;  %s980_s4 = inlined_call_operand.vmem [shape: f32[1,256], index: 4, kind: input, shape index: {}]   ;;  %s981_s10 = inlined_call_operand.vmem [shape: f32[1,128], index: 10, kind: input, shape index: {}]   ;;  %s982_s6 = inlined_call_operand.vmem [shape: f32[1,128], index: 6, kind: input, shape index: {}]   ;;  %s983_s11 = inlined_call_operand.vmem [shape: f32[8,1], index: 11, kind: output, shape index: {}]  }
   0x1   :  { %v715_v0 = vld [vmem:[%s972_s3 + $0x14] ss:$8 sps:$4 sm:$0xff]   ;;  %114 = vmatprep.mubr.bf16.mxu1 %v767_v1  ;;  %394 = vmatprep.mubr.bf16.mxu0 %v767_v1  ;;  %v719_v3 = vld [vmem:[%s972_s3 + $0x10] ss:$8 sps:$4 sm:$0xff]   ;;  %v721_v5 = vld [vmem:[%s972_s3 + $0x4] ss:$8 sps:$4 sm:$0xff]  }
   0x2   :  { %v717_v2 = vld [vmem:[%s973_s7 + $0x14] ss:$8 sps:$4 sm:$0xff]   ;;  %94 = vmatprep.subr.bf16.mxu1 %v715_v0  ;;  %v720_v4 = vld [vmem:[%s973_s7 + $0x10] ss:$8 sps:$4 sm:$0xff]   ;;  %v723_v6 = vld [vmem:[%s973_s7 + $0x4] ss:$8 sps:$4 sm:$0xff]  }
   0x3   :  { %374 = vmatprep.subr.bf16.mxu0 %v717_v2  ;;  %95 = vmatpush1.bf16.msra.mxu1 %v719_v3  ;;  %v725_v7 = vld [vmem:[%s972_s3] ss:$8 sps:$4 sm:$0xff]   ;;  %v727_v14 = vld [vmem:[%s977_s9 + $0x78] sm:$0xff]   ;;  %v730_v17 = vld [vmem:[%s977_s9 + $0x70] sm:$0xff]   ;;  %v49_v47 = vshrl.u32 %v48_v46, 7 }
   0x4   :  { %375 = vmatpush1.bf16.msra.mxu0 %v720_v4  ;;  %96 = vmatprep.subr.bf16.mxu1 %v721_v5  ;;  %v726_v8 = vld [vmem:[%s973_s7] ss:$8 sps:$4 sm:$0xff]   ;;  %v728_v15 = vld [vmem:[%s977_s9 + $0x38] sm:$0xff]   ;;  %v732_v19 = vld [vmem:[%s977_s9 + $0x30] sm:$0xff]  }
   0x5   :  { %v39_v9 = vld [vmem:[%s974_s0] sm:$0xff]  ;;  %376 = vmatprep.subr.bf16.mxu0 %v723_v6  ;;  %v729_v16 = vld [vmem:[%s978_s5 + $0x78] sm:$0xff]   ;;  %v733_v20 = vld [vmem:[%s978_s5 + $0x70] sm:$0xff]   ;;  %v50_v49 = vsub.s32 0, %v49_v47  ;;  %v54_v50 = vsub.s32 1, %v49_v47 }
   0x6   :  { %v40_v10 = vld [vmem:[%s975_s1] sm:$0xff]  ;;  %v731_v18 = vld [vmem:[%s978_s5 + $0x38] sm:$0xff]   ;;  %v734_v21 = vld [vmem:[%s977_s9 + $0x68] sm:$0xff]  }
   0x7   :  { %v321_v11 = vld [vmem:[%s976_s2] sm:$0xff]  ;;  %v41_v12 = vpack.c.bf16 %v40_v10, %v39_v9  ;;  %97 = vmatpush1.bf16.msra.mxu1 %v725_v7  ;;  %v735_v22 = vld [vmem:[%s978_s5 + $0x30] sm:$0xff]   ;;  %v736_v23 = vld [vmem:[%s977_s9 + $0x28] sm:$0xff]  }
   0x8   :  { %v322_v13 = vpack.c.bf16 %v321_v11, %v321_v11  ;;  %377 = vmatpush1.bf16.msra.mxu0 %v726_v8  ;;  %670 = vmatprep.subr.bf16.mxu1 %v729_v16  ;;  %v737_v24 = vld [vmem:[%s978_s5 + $0x68] sm:$0xff]   ;;  %v738_v25 = vld [vmem:[%s977_s9 + $0x60] sm:$0xff]   ;;  %v742_v29 = vld [vmem:[%s977_s9 + $0x58] sm:$0xff]  }
   0x9   :  { %692 = vmatprep.subr.bf16.mxu0 %v727_v14  ;;  %v739_v26 = vld [vmem:[%s978_s5 + $0x28] sm:$0xff]   ;;  %v740_v27 = vld [vmem:[%s977_s9 + $0x20] sm:$0xff]   ;;  %v744_v31 = vld [vmem:[%s977_s9 + $0x18] sm:$0xff]  }
   0xa   :  { %629 = vmatmul.mubr.msk.bf16.vlgmr.msra.gmra.mxu1 %vm78_vm0, %v41_v12  ;;  %v741_v28 = vld [vmem:[%s978_s5 + $0x60] sm:$0xff]   ;;  %v745_v32 = vld [vmem:[%s978_s5 + $0x58] sm:$0xff]   ;;  %v746_v33 = vld [vmem:[%s977_s9 + $0x50] sm:$0xff]  }
   0xb   :  { %651 = vmatmul.mubr.msk.bf16.vlgmr.msra.gmra.mxu0 %vm78_vm0, %v322_v13  ;;  %671 = vmatpush3.bf16.msra.mxu1 %v731_v18  ;;  %v743_v30 = vld [vmem:[%s978_s5 + $0x20] sm:$0xff]   ;;  %v747_v34 = vld [vmem:[%s978_s5 + $0x18] sm:$0xff]   ;;  %v748_v35 = vld [vmem:[%s977_s9 + $0x10] sm:$0xff]  }
   0xc   :  { %693 = vmatpush3.bf16.msra.mxu0 %v728_v15  ;;  %672 = vmatprep.subr.bf16.mxu1 %v733_v20  ;;  %v749_v36 = vld [vmem:[%s978_s5 + $0x50] sm:$0xff]   ;;  %v750_v37 = vld [vmem:[%s977_s9 + $0x48] sm:$0xff]   ;;  %v754_v41 = vld [vmem:[%s977_s9 + $0x40] sm:$0xff]  }
   0xd   :  { %694 = vmatprep.subr.bf16.mxu0 %v730_v17  ;;  %v751_v38 = vld [vmem:[%s978_s5 + $0x10] sm:$0xff]   ;;  %v752_v39 = vld [vmem:[%s977_s9 + $0x8] sm:$0xff]   ;;  %v756_v43 = vld [vmem:[%s977_s9] sm:$0xff]  }
   0xe   :  { %v753_v40 = vld [vmem:[%s978_s5 + $0x48] sm:$0xff]   ;;  %v757_v44 = vld [vmem:[%s978_s5 + $0x40] sm:$0xff]  }
   0xf   :  { %673 = vmatpush3.bf16.msra.mxu1 %v735_v22  ;;  %v755_v42 = vld [vmem:[%s978_s5 + $0x8] sm:$0xff]   ;;  %v758_v45 = vld [vmem:[%s978_s5] sm:$0xff]  }
  0x10   :  { %695 = vmatpush3.bf16.msra.mxu0 %v732_v19  ;;  %674 = vmatprep.subr.bf16.mxu1 %v737_v24  ;;  %v327_v48 = vld [vmem:[%s979_s8] sm:$0x3] }
  0x11   :  { %696 = vmatprep.subr.bf16.mxu0 %v734_v21  ;;  %v46_v51 = vld [vmem:[%s980_s4] sm:$0x3]  ;;  %v332_v52 = vrot.slane %v327_v48, %v50_v49  ;;  %v336_v57 = vrot.slane %v327_v48, %v54_v50 }
  0x12   :  { %v51_v53 = vrot.slane %v46_v51, %v50_v49  ;;  %v55_v56 = vrot.slane %v46_v51, %v54_v50 }
  0x13   :  { %675 = vmatpush3.bf16.msra.mxu1 %v739_v26 }
  0x14   :  { %697 = vmatpush3.bf16.msra.mxu0 %v736_v23  ;;  %676 = vmatprep.subr.bf16.mxu1 %v741_v28  ;;  %v652_v23 = vld [vmem:[%s981_s10] ss:$0 sm:$0xff] }
  0x15   :  { %698 = vmatprep.subr.bf16.mxu0 %v738_v25  ;;  %v630_v28 = vld [vmem:[%s982_s6] ss:$0 sm:$0xff] }
  0x17   :  { %677 = vmatpush3.bf16.msra.mxu1 %v743_v30 }
  0x18   :  { %699 = vmatpush3.bf16.msra.mxu0 %v740_v27  ;;  %678 = vmatprep.subr.bf16.mxu1 %v745_v32 }
  0x19   :  { %700 = vmatprep.subr.bf16.mxu0 %v742_v29 }
  0x1b   :  { %679 = vmatpush3.bf16.msra.mxu1 %v747_v34 }
  0x1c   :  { %701 = vmatpush3.bf16.msra.mxu0 %v744_v31  ;;  %680 = vmatprep.subr.bf16.mxu1 %v749_v36 }
  0x1d   :  { %702 = vmatprep.subr.bf16.mxu0 %v746_v33 }
  0x1f   :  { %681 = vmatpush3.bf16.msra.mxu1 %v751_v38 }
  0x20   :  { %703 = vmatpush3.bf16.msra.mxu0 %v748_v35  ;;  %682 = vmatprep.subr.bf16.mxu1 %v753_v40 }
  0x21   :  { %704 = vmatprep.subr.bf16.mxu0 %v750_v37 }
  0x23   :  { %683 = vmatpush3.bf16.msra.mxu1 %v755_v42 }
  0x24   :  { %705 = vmatpush3.bf16.msra.mxu0 %v752_v39  ;;  %684 = vmatprep.subr.bf16.mxu1 %v757_v44 }
  0x25   :  { %706 = vmatprep.subr.bf16.mxu0 %v754_v41 }
  0x27   :  { %685 = vmatpush3.bf16.msra.mxu1 %v758_v45 }
  0x28   :  { %707 = vmatpush3.bf16.msra.mxu0 %v756_v43 }
  0xca   :  { %v116_v54 = vpop.f32.mrf.mxu1 }
  0xcb   :  { %v396_v55 = vpop.f32.mrf.mxu0  ;;  %v117_v62 = vadd.f32 %v116_v54, %v51_v53 }
  0xcc   :  { %v397_v58 = vadd.f32 %v396_v55, %v332_v52  ;;  %v118_v59 = vpop.f32.mrf.mxu1 }
  0xcd   :  { %v398_v60 = vpop.f32.mrf.mxu0  ;;  %v119_v63 = vadd.f32 %v118_v59, %v55_v56  ;;  %vm125_vm4 = vcmp.gt.f32.partialorder %v117_v62, 0.0  ;;  %v129_v11 = vmul.f32 0.2, %v117_v62 }
  0xce   :  { %vm403_vm1 = vcmp.gt.f32.partialorder %v397_v58, 0.0  ;;  %v405_v61 = vmul.f32 0.2, %v397_v58  ;;  %v399_v0 = vadd.f32 %v398_v60, %v336_v57  ;;  %v120_v1 = vpop.f32.mrf.mxu1 }
  0xcf   :  { %v400_v2 = vpop.f32.mrf.mxu0  ;;  %v121_v3 = vadd.f32 %v120_v1, %v51_v53  ;;  %v130_v5 = vmul.f32 0.2, %v119_v63  ;;  %vm126_vm5 = vcmp.gt.f32.partialorder %v119_v63, 0.0  ;;  %v133_v19 = vsel %vm125_vm4, %v117_v62, %v129_v11 }
  0xd0   :  { %v407_v4 = vsel %vm403_vm1, %v397_v58, %v405_v61  ;;  %vm404_vm2 = vcmp.gt.f32.partialorder %v399_v0, 0.0  ;;  %v122_v6 = vpop.f32.mrf.mxu1  ;;  %v406_v8 = vmul.f32 0.2, %v399_v0 }
  0xd1   :  { %v401_v7 = vpop.f32.mrf.mxu0  ;;  %vm127_vm3 = vcmp.gt.f32.partialorder %v121_v3, 0.0  ;;  %v131_v9 = vmul.f32 0.2, %v121_v3  ;;  %v123_v10 = vadd.f32 %v122_v6, %v55_v56  ;;  %v409_v12 = vpack.c.bf16 %v407_v4, %v407_v4 }
  0xd2   :  { %v408_v14 = vsel %vm404_vm2, %v399_v0, %v406_v8  ;;  %v134_v17 = vsel %vm126_vm5, %v119_v63, %v130_v5 }
  0xd3   :  { %vm128_vm6 = vcmp.gt.f32.partialorder %v123_v10, 0.0  ;;  %v132_v13 = vmul.f32 0.2, %v123_v10  ;;  %v135_v15 = vsel %vm127_vm3, %v121_v3, %v131_v9  ;;  %v410_v16 = vpack.c.bf16 %v408_v14, %v408_v14 }
  0xd4   :  { %v137_v21 = vpack.c.bf16 %v135_v15, %v133_v19 }
  0xd5   :  { %v136_v18 = vsel %vm128_vm6, %v123_v10, %v132_v13  ;;  %578 = vmatprep.mubr.bf16.mxu0 %v410_v16 }
  0xd6   :  { %v138_v20 = vpack.c.bf16 %v136_v18, %v134_v17  ;;  %579 = vmatmul.mubr.bf16.vlgmr.msra.gmra.mxu0 %v409_v12 }
  0xd8   :  { %306 = vmatprep.mubr.bf16.mxu1 %v138_v20 }
  0xd9   :  { %307 = vmatmul.mubr.bf16.vlgmr.msra.gmra.mxu1 %v137_v21 }
 0x196   :  { %v708_v22 = vpop.f32.mrf.mxu0 }
 0x198   :  { %v709_v24 = vpop.f32.mrf.mxu0 }
 0x199   :  { %v686_v25 = vpop.f32.mrf.mxu1  ;;  %v710_v26 = vadd.f32 %v709_v24, %v708_v22 }
 0x19a   :  { %v711_v27 = vpop.f32.mrf.mxu0 }
 0x19b   :  { %v687_v29 = vpop.f32.mrf.mxu1  ;;  %v581_v30 = vadd.f32 %v710_v26, %v652_v23 }
 0x19c   :  { %v688_v31 = vadd.f32 %v687_v29, %v686_v25  ;;  %v712_v32 = vpop.f32.mrf.mxu0 }
 0x19d   :  { %v689_v33 = vpop.f32.mrf.mxu1  ;;  %vm586_vm7 = vcmp.gt.f32.partialorder %v581_v30, 0.0  ;;  %v587_v35 = vmul.f32 0.2, %v581_v30 }
 0x19e   :  { %v309_v34 = vadd.f32 %v688_v31, %v630_v28 }
 0x19f   :  { %v690_v36 = vpop.f32.mrf.mxu1  ;;  %v588_v38 = vsel %vm586_vm7, %v581_v30, %v587_v35 }
 0x1a0   :  { %v691_v37 = vadd.f32 %v690_v36, %v689_v33  ;;  %vm315_vm8 = vcmp.gt.f32.partialorder %v309_v34, 0.0  ;;  %v317_v39 = vmul.f32 0.2, %v309_v34  ;;  %v589_v40 = vmul.f32 %v588_v38, %v588_v38 }
 0x1a2   :  { %v312_v41 = vadd.f32 %v691_v37, %v630_v28  ;;  %v319_v42 = vsel %vm315_vm8, %v309_v34, %v317_v39  ;;  %590 = vadd.xlane.f32.xlu0 %v589_v40 }
 0x1a3   :  { %v592_v43 = vmul.f32 %v319_v42, %v319_v42  ;;  %v598_v48 = vmul.f32 %v588_v38, %v319_v42 }
 0x1a4   :  { %vm316_vm9 = vcmp.gt.f32.partialorder %v312_v41, 0.0  ;;  %v318_v44 = vmul.f32 0.2, %v312_v41 }
 0x1a6   :  { %v320_v45 = vsel %vm316_vm9, %v312_v41, %v318_v44  ;;  %593 = vadd.xlane.f32.xlu0 %v592_v43 }
 0x1a7   :  { %v595_v46 = vmul.f32 %v320_v45, %v320_v45  ;;  %v601_v47 = vmul.f32 %v588_v38, %v320_v45 }
 0x1a9   :  { %596 = vadd.xlane.f32.xlu1 %v595_v46 }
 0x1aa   :  { %602 = vadd.xlane.f32.xlu0 %v601_v47 }
 0x1ad   :  { %599 = vadd.xlane.f32.xlu1 %v598_v48 }
 0x22b   :  { %v591_v49 = vpop.xlane.xlu0 %590 }
 0x22f   :  { %v594_v50 = vpop.xlane.xlu0 %593 }
 0x230   :  { %v604_v51 = vmul.f32 %v594_v50, %v591_v49 }
 0x232   :  { %v597_v52 = vpop.xlane.xlu1 %596  ;;  %759 = vrsqrt.f32 %v604_v51 }
 0x233   :  { %v608_v53 = vmul.f32 %v597_v52, %v591_v49  ;;  %v603_v58 = vpop.xlane.xlu0 %602 }
 0x235   :  { %761 = vrsqrt.f32 %v608_v53 }
 0x236   :  { %v600_v59 = vpop.xlane.xlu1 %599 }
 0x23f   :  { %v760_v54 = vpop.eup %759 }
 0x240   :  { %v606_v55 = vmin.f32 %v760_v54, 1e+08 }
 0x242   :  { %v762_v56 = vpop.eup %761  ;;  %v607_v61 = vmul.f32 %v606_v55, %v600_v59 }
 0x243   :  { %v610_v57 = vmin.f32 %v762_v56, 1e+08 }
 0x245   :  { %v611_v60 = vmul.f32 %v610_v57, %v603_v58 }
 0x247   :  { %v612_v62 = vsub.f32 %v607_v61, %v611_v60 }
 0x249   :  { %v669_v63 = vmul.f32 -1.442695, %v612_v62 }
 0x24b   :  { %763 = vpow2.f32 %v669_v63 }
 0x258   :  { %v764_v0 = vpop.eup %763 }
 0x259   :  { %v616_v1 = vadd.f32 1.0, %v764_v0 }
 0x25b   :  { %765 = vrcp.f32 %v616_v1 }
 0x268   :  { %v766_v2 = vpop.eup %765 }
 0x269   :  { %620 = vst.msk [vmem:[%s983_s11] sm:$0xff] %vm619_vm10, %v766_v2 }

</bundles_post_ra>
